<compile_context>
chip_gen: v5e
topology: v5e:2x2
jax: 0.10.0
libtpu: 0.0.40
codegen_flags: <defaults>
</compile_context>

<pallas_src>
import math
import functools

import jax
import jax.numpy as jnp
from jax.experimental import pallas as pl
from jax.experimental.pallas import tpu as pltpu


def make_positional_encoding(d_model: int, max_len: int) -> jnp.ndarray:
    """Builds the (max_len, d_model) sinusoidal PE buffer (same math as torch)."""
    position = jnp.arange(max_len, dtype=jnp.float32)[:, None]            # (L, 1)
    div_term = jnp.exp(
        jnp.arange(0, d_model, 2, dtype=jnp.float32)
        * (-math.log(10000.0) / d_model)
    )                                                                      # (D/2,)
    pe = jnp.zeros((max_len, d_model), dtype=jnp.float32)
    pe = pe.at[:, 0::2].set(jnp.sin(position * div_term))
    pe = pe.at[:, 1::2].set(jnp.cos(position * div_term))
    return pe


# ---------------------------------------------------------------------------
# Generation-aware VMEM / block-size policy
# ---------------------------------------------------------------------------
def _vmem_policy(itemsize: int):
    """Returns (target_block_bytes, vmem_limit_bytes).

    Six buffers are in flight (x, pe, out; each double-buffered), so the peak
    scoped-VMEM use is ~6 x block.  Block targets follow the measured tiled-add
    roofline: bigger blocks amortize the ~0.35 us per-grid-step overhead.
    """
    vmem_cap = 128 << 20
    try:
        info = pltpu.get_tpu_info()
        vmem_cap = int(getattr(info, "vmem_capacity_bytes", vmem_cap))
    except Exception:
        pass  # no TPU / interpret mode: fall back to the conservative default
    if vmem_cap <= (64 << 20):
        # v7x-class: 64 MiB physical VMEM. ~5 MiB blocks (6x5 = 30 MiB) with an
        # explicit 48 MiB scoped limit leaves headroom under the physical cap.
        return 5 << 20, 48 << 20
    # v5e / v6e-class: 128 MiB physical. ~4 MiB blocks (6x4 = 24 MiB); raise the
    # scoped limit explicitly (v5e's default is only 16 MiB), well under 128 MiB.
    return 4 << 20, 40 << 20


# ---------------------------------------------------------------------------
# Tiling heuristics
# ---------------------------------------------------------------------------
def _pick_tiles(S: int, D: int, itemsize: int, target_bytes: int):
    """Choose a (B, R, TC) re-view of (B, S, D) and a (1, TR, TC) block.

    Guarantees (so the (8, 128) block constraint is respected):
      * TC % 128 == 0 or TC equals the full last dim; TC divides R's row width
      * TR is a multiple of the dtype-aware sublane step, or TR == R
      * block bytes roughly <= target_bytes
    """
    step = max(8, 32 // itemsize)        # sublane step: f32 -> 8, bf16 -> 16, int8 -> 32
    N = S * D
    target_elems = max(128, target_bytes // itemsize)

    def best_divisor(n, cap, stp):
        cap = (min(n, cap) // stp) * stp
        c = cap
        while c >= stp:
            if n % c == 0:
                return c
            c -= stp
        return None

    if N % 128 == 0:
        # Lane-dense flattened view: (R, TC), TC a multiple of 128 dividing N.
        tc = best_divisor(N, min(65536, target_elems), 128) or 128
        r = N // tc
        if r * tc * itemsize <= target_bytes:
            return r, r, tc              # one block covers the whole flattened row
        tr = best_divisor(r, max(step, target_elems // tc), step)
        if tr is None:
            tc = 128
            r = N // tc
            tr = best_divisor(r, max(step, target_elems // tc), step) or r
        return r, tr, tc

    # Odd feature size: keep the original (S, D) view and tile over S with a
    # multiple-of-`step` row count (full-sublane stores, pipelining preserved).
    tr = best_divisor(S, max(step, target_elems // max(D, 1)), step) or S
    return S, tr, D


# ---------------------------------------------------------------------------
# Kernel
# ---------------------------------------------------------------------------
def _pos_enc_kernel(x_ref, pe_ref, o_ref, *, dropout_p: float, seed: int):
    # x_ref, pe_ref, o_ref: (1, TR, TC) blocks; the pe block is shared across
    # the batch axis (its index_map ignores b).  Add in f32 (pe is the f32
    # torch-style buffer), cast once at the store -> matches torch promotion.
    val = x_ref[...].astype(jnp.float32) + pe_ref[...].astype(jnp.float32)

    if dropout_p > 0.0:
        # Inverted dropout (nn.Dropout train mode): keep w.p. (1-p), scale 1/(1-p).
        keep_prob = 1.0 - dropout_p
        step = pl.program_id(0) * pl.num_programs(1) + pl.program_id(1)
        # Hash-mix the tile index into the seed (adjacent raw seeds can correlate).
        mixed = jnp.int32(seed & 0x7FFFFFFF) ^ (step * jnp.int32(0x61C88647))
        pltpu.prng_seed(mixed)
        bits = pltpu.prng_random_bits(val.shape)
        if bits.dtype != jnp.uint32:            # free reinterpret if needed
            bits = pltpu.bitcast(bits, jnp.uint32)
        # Direct integer threshold: no shift / convert / fp compare.  Clamping to
        # 2^32-1 biases the keep probability by <= 2^-32 (negligible).
        thresh = jnp.uint32(min(int(round(keep_prob * (1 << 32))), (1 << 32) - 1))
        keep = bits < thresh
        val = jnp.where(keep, val * (1.0 / keep_prob), jnp.zeros_like(val))

    o_ref[...] = val.astype(o_ref.dtype)


# ---------------------------------------------------------------------------
# Wrapper
# ---------------------------------------------------------------------------
def positional_encoding_forward(
    x,
    pe,
    *,
    dropout_p: float = 0.0,
    seed: int = 0,
    donate_x: bool = False,
    min_pallas_bytes: int = 1 << 20,
):
    """x: (B, S, D), pe: (max_len, D) f32 -> (B, S, D). dropout_p>0 => train dropout."""
    B, S, D = x.shape
    itemsize = jnp.dtype(x.dtype).itemsize
    out_dtype = jnp.promote_types(x.dtype, pe.dtype)   # torch: x + f32 buffer promotes
    pe_s = pe[:S]

    # Fast path for tiny inputs: per-call / per-grid-step overhead dominates and
    # XLA's fused elementwise op is strictly faster.
    if B * S * D * itemsize < min_pallas_bytes:
        val = x.astype(out_dtype) + pe_s[None].astype(out_dtype)
        if dropout_p > 0.0:
            keep = jax.random.bernoulli(jax.random.PRNGKey(seed), 1.0 - dropout_p, val.shape)
            val = jnp.where(keep, val / (1.0 - dropout_p), jnp.zeros_like(val))
        return val

    target_bytes, vmem_limit = _vmem_policy(itemsize)
    R, TR, TC = _pick_tiles(S, D, itemsize, target_bytes)

    # Contiguous re-views -> no data movement.  pe stays f32.
    x3 = x.reshape(B, R, TC)
    pe3 = pe_s.reshape(1, R, TC)

    grid = (R // TR, B)  # batch axis fastest => pe block resident across the batch

    kernel = functools.partial(
        _pos_enc_kernel, dropout_p=float(dropout_p), seed=int(seed)
    )

    # Note: at B == 1 the pe stream is ~33% extra HBM traffic; generating pe
    # in-kernel from iota + sin/cos (EUP) would remove it.  Not done here since
    # for B >= 2 the resident-pe scheme already amortizes the read.
    out = pl.pallas_call(
        kernel,
        out_shape=jax.ShapeDtypeStruct((B, R, TC), out_dtype),
        grid_spec=pltpu.PrefetchScalarGridSpec(
            num_scalar_prefetch=0,
            grid=grid,
            in_specs=[
                # x tile: one batch row, TR x TC lane-dense slab (~4-5 MiB target).
                # Bandwidth-bound => prefer bigger blocks over deeper buffering.
                pl.BlockSpec((1, TR, TC), lambda r, b: (b, r, 0)),
                # pe tile: index independent of b -> resident over the batch loop.
                pl.BlockSpec((1, TR, TC), lambda r, b: (0, r, 0)),
            ],
            out_specs=pl.BlockSpec((1, TR, TC), lambda r, b: (b, r, 0)),
        ),
        compiler_params=pltpu.CompilerParams(
            dimension_semantics=("parallel", "parallel"),
            vmem_limit_bytes=int(vmem_limit),
        ),
        input_output_aliases=({0: 0} if (donate_x and x.dtype == out_dtype) else {}),
    )(x3, pe3)

    return out.reshape(B, S, D)


if __name__ == "__main__":
    key = jax.random.PRNGKey(0)

    # Case 1: small shapes consistent with the module's forward [B, S, D].
    B, S, D = 2, 8, 32
    MAX_LEN = 16
    x = jax.random.normal(key, (B, S, D), dtype=jnp.float32)
    pe = make_positional_encoding(D, MAX_LEN)

    out = positional_encoding_forward(
        x, pe, dropout_p=0.0, seed=0, min_pallas_bytes=0  # force the Pallas path
    )
    out = jax.block_until_ready(out)
    ref = x + pe[:S][None, :, :]
    assert out.shape == (B, S, D)
    assert jnp.allclose(out, ref, atol=1e-6, rtol=1e-6), "mismatch vs reference (lane-dense path)"

    # Case 2: feature size whose flattened row is NOT a multiple of 128
    # (exercises the tile-over-S fallback path).
    D2 = 20
    x2 = jax.random.normal(jax.random.PRNGKey(1), (B, S, D2), dtype=jnp.float32)
    pe2 = make_positional_encoding(D2, MAX_LEN)
    out2 = positional_encoding_forward(x2, pe2, dropout_p=0.0, seed=0, min_pallas_bytes=0)
    out2 = jax.block_until_ready(out2)
    ref2 = x2 + pe2[:S][None, :, :]
    assert jnp.allclose(out2, ref2, atol=1e-6, rtol=1e-6), "mismatch vs reference (odd-D path)"

    print("KERNEL_OK")
</pallas_src>

<mosaic_0001>
module attributes {stable_mosaic.version = 11 : i64} {
  func.func @_pos_enc_kernel(%arg0: i32, %arg1: i32, %arg2: memref<1x1x256xf32, #tpu.memory_space<vmem>>, %arg3: memref<1x1x256xf32, #tpu.memory_space<vmem>>, %arg4: memref<1x1x256xf32, #tpu.memory_space<vmem>>) attributes {dimension_semantics = [#tpu.dimension_semantics<parallel>, #tpu.dimension_semantics<parallel>], iteration_bounds = array<i64: 1, 2>, scalar_prefetch = 0 : i64, scratch_operands = 0 : i64, tpu.core_type = #tpu.core_type<tc>, window_params = [{transform_indices = @transform_0, window_bounds = array<i64: 1, 1, 256>}, {transform_indices = @transform_1, window_bounds = array<i64: 1, 1, 256>}, {transform_indices = @transform_2, window_bounds = array<i64: 1, 1, 256>}]} {
    %c0 = arith.constant 0 : index
    %c0_0 = arith.constant 0 : index
    %c0_1 = arith.constant 0 : index
    %0 = vector.load %arg2[%c0, %c0_0, %c0_1] : memref<1x1x256xf32, #tpu.memory_space<vmem>>, vector<1x1x256xf32>
    %c0_2 = arith.constant 0 : index
    %c0_3 = arith.constant 0 : index
    %c0_4 = arith.constant 0 : index
    %1 = vector.load %arg3[%c0_2, %c0_3, %c0_4] : memref<1x1x256xf32, #tpu.memory_space<vmem>>, vector<1x1x256xf32>
    %2 = arith.addf %0, %1 : vector<1x1x256xf32>
    %c0_5 = arith.constant 0 : index
    %c0_6 = arith.constant 0 : index
    %c0_7 = arith.constant 0 : index
    %3 = vector.load %arg4[%c0_5, %c0_6, %c0_7] : memref<1x1x256xf32, #tpu.memory_space<vmem>>, vector<1x1x256xf32>
    tpu.vector_store %arg4[%c0_5, %c0_6, %c0_7], %2 {strides = array<i32>} : memref<1x1x256xf32, #tpu.memory_space<vmem>>, vector<1x1x256xf32>,
    return
  }
  func.func @transform_0(%arg0: i32, %arg1: i32) -> (i32, i32, i32) {
    %c0_i32 = arith.constant 0 : i32
    %c0_i32_0 = arith.constant 0 : i32
    return %arg1, %arg0, %c0_i32 : i32, i32, i32
  }
  func.func @transform_1(%arg0: i32, %arg1: i32) -> (i32, i32, i32) {
    %c0_i32 = arith.constant 0 : i32
    %c0_i32_0 = arith.constant 0 : i32
    %c0_i32_1 = arith.constant 0 : i32
    return %c0_i32, %arg0, %c0_i32_0 : i32, i32, i32
  }
  func.func @transform_2(%arg0: i32, %arg1: i32) -> (i32, i32, i32) {
    %c0_i32 = arith.constant 0 : i32
    %c0_i32_0 = arith.constant 0 : i32
    return %arg1, %arg0, %c0_i32 : i32, i32, i32
  }
}

</mosaic_0001>

<bundles_post_ra>
// kernel: tpu_custom_call.1
= control target key start
LH: loop header
LB: loop body
LE: loop exit
PB: predicated region body
PF: predicated region fallthrough
CT: control target
= control target key end

     0   :  { %7 = vsyncpa [#allocation3], 0  ;;  %s722_s0 = inlined_call_operand.hbm [shape: f32[2,1,256], index: 0, kind: input, shape index: {}]   ;;  %s723_s1 = inlined_call_operand.hbm [shape: f32[1,1,256], index: 1, kind: input, shape index: {}]   ;;  %s724_s2 = inlined_call_operand.hbm [shape: f32[2,1,256], index: 2, kind: output, shape index: {}]  }
   0x1   :  { %9 = vsyncpa [#allocation3 + $0x1], 0 }
   0x2   :  { %10 = vsyncpa [#allocation6], 0 }
   0x3   :  { %11 = vsyncpa [#allocation4], 0 }
   0x4   :  { %13 = vsyncpa [#allocation4 + $0x1], 0  ;;  %s573_s9 = smov 0   ;;  %s575_s10 = smov 0  }
   0x5   :  { %s577_s11 = smov 0   ;;  %s579_s12 = smov 0  }
   0x6   :  { %s581_s13 = smov 0   ;;  %s583_s14 = smov 0  }
   0x7 LB: > { %s321_s15 = sadd.s32 4294967295, %s555_s14   ;;  %s322_s16 = sadd.s32 4294967294, %s555_s14   ;;  %s555_s14 = sphi %s583_s14, %s19_s14   ;;  %s551_s13 = sphi %s581_s13, %s736_s13   ;;  %s547_s12 = sphi %s579_s12, %s735_s12   ;;  %s543_s11 = sphi %s577_s11, %s734_s11   ;;  %s539_s10 = sphi %s575_s10, %s733_s10   ;;  %s535_s9 = sphi %s573_s9, %s732_s9  }
   0x8   : > { %p53_p0 = scmp.ne.s32.totalorder %s539_s10, %s535_s9  ;;  %p607_p1 = scmp.eq.s32.totalorder %s321_s15, 0 }
   0x9   : > { %p611_p2 = scmp.eq.s32.totalorder %s321_s15, 1  ;;  %p111_p3 = scmp.eq.s32.totalorder %s322_s16, 1 }
   0xa   : > { %p617_p4 = por %p607_p1, %p53_p0  ;;  %p323_p5 = scmp.ge.s32.totalorder %s555_s14, 1 }
   0xb   : > { %p622_p6 = por %p111_p3, %p53_p0  ;;  %p118_p7 = scmp.lt.s32.totalorder %s555_s14, 3 }
   0xc   : > { %s132_s23 = sshll.u32 %s723_s1, 4  ;;  %p325_p9 = scmp.ge.s32.totalorder %s555_s14, 2  ;;  %s133_s23 = int_to_ptr.hbm [resolvable:$true] %s132_s23 }
   0xd   : > { %p630_p8 = pnand %p323_p5, %p118_p7  ;;  %s557_s25 = smov [#allocation5]  }
   0xe   : > { %s134_s26 = sshll.u32 %s557_s25, 4  ;;  %s28_s27 = sadd.s32 1, %s551_s13  ;;  %s135_s26 = int_to_ptr.vmem [resolvable:$true] %s134_s26 }
   0xf   : > { %p344_p10 = pneg %p630_p8  ;;  %p29_p12 = scmp.ge.s32.totalorder %s28_s27, 2 }
  0x10   : > { %s40_s28 = sadd.s32 1, %s543_s11  ;;  %p47_p13 = scmp.ne.s32.totalorder %s543_s11, %s539_s10 }
  0x11   : > { %p345_p11 = pnand %p344_p10, %p607_p1  ;;  %p48_p0 = scmp.eq.s32.totalorder %s555_s14, 0 }
  0x12   : > { %s738_s27 = smov (%p29_p12, %s28_s27), 0  ;;  %p652_p5 = por %p611_p2, %p47_p13 }
  0x13   : > { %347 = dma.hbm_to_vmem [thread:$0]  (!%p345_p11), %s133_s23, 32, %s135_s26, [#allocation6]  }
  0x14   : > { %p646_p3 = por %p48_p0, %p47_p13  ;;  %s35_s3 = ssub.s32 %s551_s13, %s738_s27 }
  0x15   : > { %p357_p7 = scmp.lt.s32.totalorder %s555_s14, 2  ;;  %p38_p10 = scmp.eq.s32.totalorder %s35_s3, 0 }
  0x16   : > { %s145_s4 = sand.u32 1, %s543_s11   ;;  %s327_s7 = sshll.u32 %s551_s13, 1 }
  0x17   : > { %s326_s5 = sshll.u32 %s145_s4, 1  ;;  %s155_s16 = scalar_lea.hbm %s722_s0, %s327_s7 }
  0x18   : > { %s661_s6 = scalar_select %p38_p10, %s543_s11, %s40_s28  }
  0x19   : > { %s149_s21 = scalar_lea.vmem [#allocation2], %s326_s5  ;;  %s157_s18 = sshll.u32 %s155_s16, 4  ;;  %s158_s18 = int_to_ptr.hbm [resolvable:$true] %s157_s18 }
  0x1a   : > { %s159_s22 = sshll.u32 %s149_s21, 4  ;;  %p349_p2 = pnand %p357_p7, %p646_p3  ;;  %s160_s22 = int_to_ptr.vmem [resolvable:$true] %s159_s22 }
  0x1b   : > { %s146_s23 = scalar_lea.sflag [#allocation3], %s145_s4  ;;  %168 = sbr.rel (%p630_p8) target bundleno = 50 (0x32), region = 28 }
  0x1c   : > { %351 = dma.hbm_to_vmem [thread:$0]  (!%p349_p2), %s158_s18, 32, %s160_s22, %s146_s23  }
  0x1d   : > { %s672_s25 = sand.u32 (!%p630_p8), 1, %s539_s10  }
  0x1e   : > { %s329_s26 = sshll.u32 (!%p630_p8), %s672_s25, 1  ;;  %s171_s28 = scalar_lea.sflag (!%p630_p8), [#allocation3], %s672_s25 }
  0x1f   : > { %s174_s3 = scalar_lea.vmem (!%p630_p8), [#allocation2], %s329_s26 }
  0x20   : > { %522 = dma.done.wait (%p617_p4), %s171_s28, 32  }
  0x21   : > { %524 = vsyncadd (%p617_p4), %s171_s28, 4294967264 }
  0x22   : > { %526 = dma.done.wait (%p607_p1), [#allocation6], 32  }
  0x23   : > { %528 = vsyncadd (%p607_p1), [#allocation6], 4294967264  ;;  %s333_s24 = sshll.u32 %s547_s12, 1  ;;  %v204_v0 = vlaneseq  ;;  %s200_s7 = scalar_lea.vmem [#allocation7], %s329_s26  ;;  %v201_v1 = vld [vmem:[%s174_s3] sm:$0x3] }
  0x24   : > { %s222_s5 = scalar_lea.hbm %s724_s2, %s333_s24  ;;  %s224_s8 = sshll.u32 %s200_s7, 4  ;;  %v202_v2 = vld [vmem:[#allocation5] sm:$0x3]  ;;  %s225_s8 = int_to_ptr.vmem [resolvable:$true] %s224_s8 }
  0x25   : > { %s226_s15 = sshll.u32 %s222_s5, 4  ;;  %vm206_vm0 = vcmp.lt.s32.totalorder %v204_v0, 256  ;;  %v203_v3 = vadd.f32 %v202_v2, %v201_v1  ;;  %s210_s17 = scalar_lea.sflag [#allocation4], %s672_s25  ;;  %s227_s15 = int_to_ptr.hbm [resolvable:$true] %s226_s15 }
  0x26   : > { %s483_s19 = sshra.s32 %s227_s15, 4  ;;  %s489_s22 = scalar_lea.hbm %s724_s2, 4  ;;  %s484_s19 = int_to_ptr.hbm [resolvable:$true] %s483_s19 }
  0x27   : > { %208 = vst.msk [vmem:[%s200_s7] sm:$0x3] %vm206_vm0, %v203_v3  ;;  %s485_s12 = scalar_lea.hbm %s484_s19, 2  ;;  %p490_p11 = scmp.lt.s32.totalorder %s484_s19, %s724_s2 }
  0x28   : > { %p486_p1 = scmp.ne.s32.totalorder %s484_s19, %s485_s12  ;;  %p491_p12 = scmp.lt.s32.totalorder %s489_s22, %s485_s12 }
  0x2a   : > { %p487_p4 = pnand %p486_p1, %p652_p5  ;;  %p492_p13 = por %p491_p12, %p490_p11 }
  0x2c   : > { %p488_p8 = pneg %p487_p4 }
  0x2e   : > { %p493_p0 = pnand %p492_p13, %p488_p8 }
  0x30   : > { %496 = shalt.err (!%p493_p0)
}
  0x31   : > { %342 = dma.vmem_to_hbm [thread:$0]  (%p652_p5), %s225_s8, 32, %s227_s15, %s210_s17  }
  0x32 PF: > { %s238_s25 = sand.u32 1, %s535_s9   ;;  %p353_p3 = pnand %p325_p9, %p622_p6 }
  0x33   : > { %s239_s26 = scalar_lea.sflag [#allocation4], %s238_s25 }
  0x34   : > { %p354_p7 = pneg %p353_p3 }
  0x36   : > { %530 = dma.done.wait (%p354_p7), %s239_s26, 32  }
  0x37   : > { %532 = vsyncadd (%p354_p7), %s239_s26, 4294967264  ;;  %s19_s14 = sadd.s32 1, %s555_s14   ;;  %s732_s9 = smov %s539_s10 }
  0x38   : > { %p16_p10 = scmp.ge.s32.totalorder %s19_s14, 4   ;;  %s733_s10 = smov %s543_s11 }
  0x39   : > { %s734_s11 = smov %s661_s6  ;;  %s735_s12 = smov %s551_s13 }
  0x3a   : > { %s736_s13 = smov %s738_s27  ;;  %18 = sbr.rel (!%p16_p10) target bundleno = 7 (0x7), region = 78 }
  0x3f   :  { %245 = vsyncpa [#allocation3], 1 }
  0x40   :  { %247 = vsyncpa [#allocation3 + $0x1], 1 }
  0x41   :  { %248 = vsyncpa [#allocation6], 1 }
  0x42   :  { %249 = vsyncpa [#allocation4], 1 }
  0x43   :  { %251 = vsyncpa [#allocation4 + $0x1], 1 }

</bundles_post_ra>
